<compile_context>
chip_gen: v7x
topology: tpu7x:2x2x1
jax: 0.10.0
libtpu: 0.0.40
codegen_flags: <defaults>
</compile_context>

<pallas_src>
import functools

import jax
import jax.numpy as jnp
from jax import lax
from jax.experimental import pallas as pl
from jax.experimental.pallas import tpu as pltpu


def _supcon_kernel(*refs, temperature, scale_by_temperature, block_q, block_k,
                   use_labels):
    if use_labels:
        (lab_row_ref, lab_col_ref, q_ref, k_ref,
         loss_ref, valid_ref, acc_num, acc_den, acc_npos) = refs
    else:
        (mask_ref, q_ref, k_ref,
         loss_ref, valid_ref, acc_num, acc_den, acc_npos) = refs

    i = pl.program_id(0)          # row block  ("parallel")
    j = pl.program_id(1)          # col block  ("arbitrary", innermost reduction)
    nj = pl.num_programs(1)
    inv_t = 1.0 / temperature

    @pl.when(j == 0)
    def _init():
        acc_num[...] = jnp.zeros_like(acc_num)
        acc_den[...] = jnp.zeros_like(acc_den)
        acc_npos[...] = jnp.zeros_like(acc_npos)

    # --- row-wise L2 normalization: f32 math, cast back to input dtype for the MXU ---
    def _l2_normalize(x):
        x32 = x.astype(jnp.float32)
        inv = lax.rsqrt(jnp.maximum(jnp.sum(x32 * x32, axis=1, keepdims=True), 1e-24))
        return (x32 * inv).astype(x.dtype)

    qn = _l2_normalize(q_ref[...])   # (TQ, D)
    kn = _l2_normalize(k_ref[...])   # (TK, D)  (recomputed per row block; O(B*D), cheap)

    # --- similarity tile on the MXU; for unit-norm rows the row max is the diag = 1/T ---
    dots = jnp.einsum("qd,kd->qk", qn, kn, preferred_element_type=jnp.float32)
    logits = (dots - 1.0) * inv_t    # == sim - logits_max (up to fp rounding)

    # --- masks built in-kernel (no BxB HBM traffic) ---
    gr = lax.broadcasted_iota(jnp.int32, (block_q, block_k), 0) + i * block_q
    gc = lax.broadcasted_iota(jnp.int32, (block_q, block_k), 1) + j * block_k
    off_diag = gr != gc
    if use_labels:
        same = lab_row_ref[...] == lab_col_ref[...]      # (TQ,1)==(1,TK) -> (TQ,TK)
        pos = (same & off_diag).astype(jnp.float32)
        denom_mask = off_diag.astype(jnp.float32)        # label masks always have diag==1
    else:
        m = mask_ref[...].astype(jnp.float32)
        odf = off_diag.astype(jnp.float32)
        pos = m * odf                                    # positives_mask
        denom_mask = 1.0 - m * (1.0 - odf)               # neg_mask + pos_mask = 1 - mask*eye

    e = jnp.exp(logits)
    acc_den[...] += jnp.sum(e * denom_mask, axis=1, keepdims=True)
    acc_num[...] += jnp.sum(logits * pos, axis=1, keepdims=True)
    acc_npos[...] += jnp.sum(pos, axis=1, keepdims=True)

    @pl.when(j == nj - 1)
    def _finalize():
        # TODO(synk): torch's data-dependent `raise ValueError('Log_prob has nan!')`
        # has no in-kernel host-raise equivalent; it is omitted.
        num_pos = acc_npos[...]
        valid = num_pos > 0.0
        # sum(log_probs * pos) without materializing the BxB log_probs array:
        row_sum = acc_num[...] - num_pos * jnp.log(acc_den[...])
        inv_np = pl.reciprocal(jnp.where(valid, num_pos, 1.0), approx=True)
        per_row = jnp.where(valid, row_sum * inv_np, 0.0)
        scale = -temperature if scale_by_temperature else -1.0
        loss_ref[...] = per_row * scale
        valid_ref[...] = valid.astype(jnp.float32)


def _pick_block(n, cap, align):
    """Largest tile <= cap that divides n and is a multiple of `align` (or full axis)."""
    if n <= cap:
        return n
    t = cap - cap % align
    while t >= align:
        if n % t == 0:
            return t
        t -= align
    return n   # fall back to the full axis — always a legal block shape


def supcon_loss(features, labels=None, mask=None, *, temperature=0.07,
                scale_by_temperature=True, block_q=256, block_k=512):
    """JAX/Pallas equivalent of SupConLoss.forward."""
    features = jnp.asarray(features)
    if features.ndim != 2:
        raise ValueError("features must be [batch_size, hidden_dim]")
    B, D = features.shape

    if labels is not None and mask is not None:
        raise ValueError("Cannot define both `labels` and `mask`")
    use_labels = mask is None
    if use_labels:
        if labels is None:
            lab = jnp.arange(B, dtype=jnp.int32)     # equivalent to mask = eye(B)
        else:
            lab = jnp.asarray(labels).reshape(-1).astype(jnp.int32)
            if lab.shape[0] != B:
                raise ValueError("Num of labels does not match num of features")
        lab_row = lab.reshape(B, 1)
        lab_col = lab.reshape(1, B)
    else:
        mask = jnp.asarray(mask).astype(jnp.float32)
        if mask.shape != (B, B):
            raise ValueError("mask must be [batch_size, batch_size]")

    bq = _pick_block(B, block_q, 8)      # sublane-aligned row tiles
    bk = _pick_block(B, block_k, 128)    # lane-aligned column (reduction) tiles
    grid = (B // bq, B // bk)

    feat_q_spec = pl.BlockSpec((bq, D), lambda i, j: (i, 0))
    feat_k_spec = pl.BlockSpec((bk, D), lambda i, j: (j, 0))
    if use_labels:
        in_specs = [pl.BlockSpec((bq, 1), lambda i, j: (i, 0)),
                    pl.BlockSpec((1, bk), lambda i, j: (0, j)),
                    feat_q_spec, feat_k_spec]
        args = (lab_row, lab_col, features, features)
    else:
        in_specs = [pl.BlockSpec((bq, bk), lambda i, j: (i, j)),
                    feat_q_spec, feat_k_spec]
        args = (mask, features, features)

    kernel = functools.partial(
        _supcon_kernel,
        temperature=float(temperature),
        scale_by_temperature=bool(scale_by_temperature),
        block_q=bq, block_k=bk, use_labels=use_labels)

    loss_rows, valid = pl.pallas_call(
        kernel,
        out_shape=(jax.ShapeDtypeStruct((B, 1), jnp.float32),
                   jax.ShapeDtypeStruct((B, 1), jnp.float32)),
        grid=grid,
        in_specs=in_specs,
        out_specs=(pl.BlockSpec((bq, 1), lambda i, j: (i, 0)),
                   pl.BlockSpec((bq, 1), lambda i, j: (i, 0))),
        scratch_shapes=[pltpu.VMEM((bq, 1), jnp.float32),   # acc_num
                        pltpu.VMEM((bq, 1), jnp.float32),   # acc_den
                        pltpu.VMEM((bq, 1), jnp.float32)],  # acc_npos
        compiler_params=pltpu.CompilerParams(
            dimension_semantics=("parallel", "arbitrary"),
            vmem_limit_bytes=32 * 1024 * 1024),
    )(*args)

    # Tiny O(B) epilogue. Guarded: a batch with no positive pairs returns 0.0
    # (torch would return NaN from a mean over an empty selection).
    total = jnp.sum(loss_rows)
    count = jnp.sum(valid)
    return jnp.where(count > 0.0, total / jnp.maximum(count, 1.0), 0.0)


def _supcon_loss_ref(features, mask, *, temperature=0.07, scale_by_temperature=True):
    """Pure-JAX reference mirroring the PyTorch code (for correctness check)."""
    f = features.astype(jnp.float32)
    f = f / jnp.maximum(jnp.sqrt(jnp.sum(f * f, axis=1, keepdims=True)), 1e-12)
    B = f.shape[0]
    sim = (f @ f.T) / temperature
    logits = sim - jnp.max(sim, axis=1, keepdims=True)
    exp_logits = jnp.exp(logits)
    eye = jnp.eye(B, dtype=jnp.float32)
    pos = mask * (1.0 - eye)
    neg = 1.0 - mask
    num_pos = jnp.sum(pos, axis=1)
    denom = (jnp.sum(exp_logits * neg, axis=1, keepdims=True)
             + jnp.sum(exp_logits * pos, axis=1, keepdims=True))
    log_probs = logits - jnp.log(denom)
    row_sum = jnp.sum(log_probs * pos, axis=1)
    valid = num_pos > 0
    per_row = jnp.where(valid, row_sum / jnp.where(valid, num_pos, 1.0), 0.0)
    loss = -per_row
    if scale_by_temperature:
        loss = loss * temperature
    return jnp.sum(loss) / jnp.sum(valid.astype(jnp.float32))


if __name__ == "__main__":
    key = jax.random.PRNGKey(0)
    kf, kl = jax.random.split(key)
    B, D = 8, 32   # small, TPU-aligned test shapes: [batch=8, hidden=32]
    features = jax.random.normal(kf, (B, D), dtype=jnp.float32)
    labels = jax.random.randint(kl, (B,), 0, 3, dtype=jnp.int32)
    mask = (labels.reshape(-1, 1) == labels.reshape(1, -1)).astype(jnp.float32)

    loss_labels = jax.block_until_ready(
        supcon_loss(features, labels=labels, temperature=0.07,
                    scale_by_temperature=True))
    loss_mask = jax.block_until_ready(
        supcon_loss(features, mask=mask, temperature=0.07,
                    scale_by_temperature=True))
    ref = jax.block_until_ready(
        _supcon_loss_ref(features, mask, temperature=0.07,
                         scale_by_temperature=True))

    assert jnp.isfinite(loss_labels) and jnp.isfinite(loss_mask), "loss is not finite"
    # Tolerance covers the approximate (EUP) reciprocal used for the per-row divide.
    assert jnp.allclose(loss_labels, ref, rtol=5e-3, atol=1e-4), (loss_labels, ref)
    assert jnp.allclose(loss_mask, ref, rtol=5e-3, atol=1e-4), (loss_mask, ref)
    print("KERNEL_OK")
</pallas_src>

<mosaic_0001>
module attributes {stable_mosaic.version = 11 : i64} {
  func.func @_supcon_kernel(%arg0: i32, %arg1: i32, %arg2: memref<8x1xi32, #tpu.memory_space<vmem>>, %arg3: memref<1x8xi32, #tpu.memory_space<vmem>>, %arg4: memref<8x32xf32, #tpu.memory_space<vmem>>, %arg5: memref<8x32xf32, #tpu.memory_space<vmem>>, %arg6: memref<8x1xf32, #tpu.memory_space<vmem>>, %arg7: memref<8x1xf32, #tpu.memory_space<vmem>>, %arg8: memref<8x1xf32, #tpu.memory_space<vmem>>, %arg9: memref<8x1xf32, #tpu.memory_space<vmem>>, %arg10: memref<8x1xf32, #tpu.memory_space<vmem>>) attributes {dimension_semantics = [#tpu.dimension_semantics<parallel>, #tpu.dimension_semantics<arbitrary>], iteration_bounds = array<i64: 1, 1>, scalar_prefetch = 0 : i64, scratch_operands = 3 : i64, tpu.core_type = #tpu.core_type<tc>, window_params = [{transform_indices = @transform_0, window_bounds = array<i64: 8, 1>}, {transform_indices = @transform_1, window_bounds = array<i64: 1, 8>}, {transform_indices = @transform_2, window_bounds = array<i64: 8, 32>}, {transform_indices = @transform_3, window_bounds = array<i64: 8, 32>}, {transform_indices = @transform_4, window_bounds = array<i64: 8, 1>}, {transform_indices = @transform_5, window_bounds = array<i64: 8, 1>}]} {
    %c0_i32 = arith.constant 0 : i32
    %0 = arith.cmpi eq, %arg1, %c0_i32 : i32
    %1 = arith.extui %0 : i1 to i32
    %c0_i32_0 = arith.constant 0 : i32
    %2 = arith.cmpi ne, %1, %c0_i32_0 : i32
    scf.if %2 {
      %cst_32 = arith.constant 0.000000e+00 : f32
      %66 = vector.broadcast %cst_32 : f32 to vector<8x1xf32>
      %c0_33 = arith.constant 0 : index
      %c0_34 = arith.constant 0 : index
      %67 = vector.load %arg8[%c0_33, %c0_34] : memref<8x1xf32, #tpu.memory_space<vmem>>, vector<8x1xf32>
      tpu.vector_store %arg8[%c0_33, %c0_34], %66 {strides = array<i32>} : memref<8x1xf32, #tpu.memory_space<vmem>>, vector<8x1xf32>,
      %cst_35 = arith.constant 0.000000e+00 : f32
      %68 = vector.broadcast %cst_35 : f32 to vector<8x1xf32>
      %c0_36 = arith.constant 0 : index
      %c0_37 = arith.constant 0 : index
      %69 = vector.load %arg9[%c0_36, %c0_37] : memref<8x1xf32, #tpu.memory_space<vmem>>, vector<8x1xf32>
      tpu.vector_store %arg9[%c0_36, %c0_37], %68 {strides = array<i32>} : memref<8x1xf32, #tpu.memory_space<vmem>>, vector<8x1xf32>,
      %cst_38 = arith.constant 0.000000e+00 : f32
      %70 = vector.broadcast %cst_38 : f32 to vector<8x1xf32>
      %c0_39 = arith.constant 0 : index
      %c0_40 = arith.constant 0 : index
      %71 = vector.load %arg10[%c0_39, %c0_40] : memref<8x1xf32, #tpu.memory_space<vmem>>, vector<8x1xf32>
      tpu.vector_store %arg10[%c0_39, %c0_40], %70 {strides = array<i32>} : memref<8x1xf32, #tpu.memory_space<vmem>>, vector<8x1xf32>,
    } else {
    }
    %c0 = arith.constant 0 : index
    %c0_1 = arith.constant 0 : index
    %3 = vector.load %arg4[%c0, %c0_1] : memref<8x32xf32, #tpu.memory_space<vmem>>, vector<8x32xf32>
    %4 = arith.mulf %3, %3 : vector<8x32xf32>
    %cst = arith.constant dense<0.000000e+00> : vector<8xf32>
    %5 = vector.multi_reduction <add>, %4, %cst [1] : vector<8x32xf32> to vector<8xf32>
    %6 = vector.shape_cast %5 : vector<8xf32> to vector<8x1xf32>
    %cst_2 = arith.constant 1.000000e-24 : f32
    %7 = vector.broadcast %cst_2 : f32 to vector<8x1xf32>
    %8 = arith.maximumf %6, %7 : vector<8x1xf32>
    %9 = math.rsqrt %8 : vector<8x1xf32>
    %10 = vector.broadcast %9 : vector<8x1xf32> to vector<8x32xf32>
    %11 = arith.mulf %3, %10 : vector<8x32xf32>
    %c0_3 = arith.constant 0 : index
    %c0_4 = arith.constant 0 : index
    %12 = vector.load %arg5[%c0_3, %c0_4] : memref<8x32xf32, #tpu.memory_space<vmem>>, vector<8x32xf32>
    %13 = arith.mulf %12, %12 : vector<8x32xf32>
    %cst_5 = arith.constant dense<0.000000e+00> : vector<8xf32>
    %14 = vector.multi_reduction <add>, %13, %cst_5 [1] : vector<8x32xf32> to vector<8xf32>
    %15 = vector.shape_cast %14 : vector<8xf32> to vector<8x1xf32>
    %cst_6 = arith.constant 1.000000e-24 : f32
    %16 = vector.broadcast %cst_6 : f32 to vector<8x1xf32>
    %17 = arith.maximumf %15, %16 : vector<8x1xf32>
    %18 = math.rsqrt %17 : vector<8x1xf32>
    %19 = vector.broadcast %18 : vector<8x1xf32> to vector<8x32xf32>
    %20 = arith.mulf %12, %19 : vector<8x32xf32>
    "tpu.trace_start"() <{level = 10 : i32, message = "qd,kd->qk"}> : () -> ()
    %cst_7 = arith.constant dense<0.000000e+00> : vector<8x8xf32>
    %21 = tpu.matmul %11, %20, %cst_7 {dimension_numbers = #tpu.dot_dimension_numbers<[1], [1], [0], [0], [0, 0, 1, 0], [], []>} : vector<8x32xf32>, vector<8x32xf32>, vector<8x8xf32> -> vector<8x8xf32>
    "tpu.trace_stop"() : () -> ()
    %cst_8 = arith.constant 1.000000e+00 : f32
    %22 = vector.broadcast %cst_8 : f32 to vector<8x8xf32>
    %23 = arith.subf %21, %22 : vector<8x8xf32>
    %cst_9 = arith.constant 14.2857141 : f32
    %24 = vector.broadcast %cst_9 : f32 to vector<8x8xf32>
    %25 = arith.mulf %23, %24 : vector<8x8xf32>
    %26 = tpu.iota {dimensions = array<i32: 0>} : vector<8x8xi32>
    %c8_i32 = arith.constant 8 : i32
    %27 = arith.muli %arg0, %c8_i32 : i32
    %28 = vector.broadcast %27 : i32 to vector<8x8xi32>
    %29 = arith.addi %26, %28 : vector<8x8xi32>
    %30 = tpu.iota {dimensions = array<i32: 1>} : vector<8x8xi32>
    %c8_i32_10 = arith.constant 8 : i32
    %31 = arith.muli %arg1, %c8_i32_10 : i32
    %32 = vector.broadcast %31 : i32 to vector<8x8xi32>
    %33 = arith.addi %30, %32 : vector<8x8xi32>
    %34 = arith.cmpi ne, %29, %33 : vector<8x8xi32>
    %c0_11 = arith.constant 0 : index
    %c0_12 = arith.constant 0 : index
    %35 = vector.load %arg2[%c0_11, %c0_12] : memref<8x1xi32, #tpu.memory_space<vmem>>, vector<8x1xi32>
    %c0_13 = arith.constant 0 : index
    %c0_14 = arith.constant 0 : index
    %36 = vector.load %arg3[%c0_13, %c0_14] : memref<1x8xi32, #tpu.memory_space<vmem>>, vector<1x8xi32>
    %37 = vector.broadcast %35 : vector<8x1xi32> to vector<8x8xi32>
    %38 = vector.broadcast %36 : vector<1x8xi32> to vector<8x8xi32>
    %39 = arith.cmpi eq, %37, %38 : vector<8x8xi32>
    %40 = arith.andi %39, %34 : vector<8x8xi1>
    %41 = arith.extui %40 : vector<8x8xi1> to vector<8x8xi32>
    %42 = arith.sitofp %41 : vector<8x8xi32> to vector<8x8xf32>
    %43 = arith.extui %34 : vector<8x8xi1> to vector<8x8xi32>
    %44 = arith.sitofp %43 : vector<8x8xi32> to vector<8x8xf32>
    %45 = math.exp %25 : vector<8x8xf32>
    %c0_15 = arith.constant 0 : index
    %c0_16 = arith.constant 0 : index
    %46 = vector.load %arg9[%c0_15, %c0_16] : memref<8x1xf32, #tpu.memory_space<vmem>>, vector<8x1xf32>
    %47 = arith.mulf %45, %44 : vector<8x8xf32>
    %cst_17 = arith.constant dense<0.000000e+00> : vector<8xf32>
    %48 = vector.multi_reduction <add>, %47, %cst_17 [1] : vector<8x8xf32> to vector<8xf32>
    %49 = vector.shape_cast %48 : vector<8xf32> to vector<8x1xf32>
    %50 = arith.addf %46, %49 : vector<8x1xf32>
    %c0_18 = arith.constant 0 : index
    %c0_19 = arith.constant 0 : index
    %51 = vector.load %arg9[%c0_18, %c0_19] : memref<8x1xf32, #tpu.memory_space<vmem>>, vector<8x1xf32>
    tpu.vector_store %arg9[%c0_18, %c0_19], %50 {strides = array<i32>} : memref<8x1xf32, #tpu.memory_space<vmem>>, vector<8x1xf32>,
    %c0_20 = arith.constant 0 : index
    %c0_21 = arith.constant 0 : index
    %52 = vector.load %arg8[%c0_20, %c0_21] : memref<8x1xf32, #tpu.memory_space<vmem>>, vector<8x1xf32>
    %53 = arith.mulf %25, %42 : vector<8x8xf32>
    %cst_22 = arith.constant dense<0.000000e+00> : vector<8xf32>
    %54 = vector.multi_reduction <add>, %53, %cst_22 [1] : vector<8x8xf32> to vector<8xf32>
    %55 = vector.shape_cast %54 : vector<8xf32> to vector<8x1xf32>
    %56 = arith.addf %52, %55 : vector<8x1xf32>
    %c0_23 = arith.constant 0 : index
    %c0_24 = arith.constant 0 : index
    %57 = vector.load %arg8[%c0_23, %c0_24] : memref<8x1xf32, #tpu.memory_space<vmem>>, vector<8x1xf32>
    tpu.vector_store %arg8[%c0_23, %c0_24], %56 {strides = array<i32>} : memref<8x1xf32, #tpu.memory_space<vmem>>, vector<8x1xf32>,
    %c0_25 = arith.constant 0 : index
    %c0_26 = arith.constant 0 : index
    %58 = vector.load %arg10[%c0_25, %c0_26] : memref<8x1xf32, #tpu.memory_space<vmem>>, vector<8x1xf32>
    %cst_27 = arith.constant dense<0.000000e+00> : vector<8xf32>
    %59 = vector.multi_reduction <add>, %42, %cst_27 [1] : vector<8x8xf32> to vector<8xf32>
    %60 = vector.shape_cast %59 : vector<8xf32> to vector<8x1xf32>
    %61 = arith.addf %58, %60 : vector<8x1xf32>
    %c0_28 = arith.constant 0 : index
    %c0_29 = arith.constant 0 : index
    %62 = vector.load %arg10[%c0_28, %c0_29] : memref<8x1xf32, #tpu.memory_space<vmem>>, vector<8x1xf32>
    tpu.vector_store %arg10[%c0_28, %c0_29], %61 {strides = array<i32>} : memref<8x1xf32, #tpu.memory_space<vmem>>, vector<8x1xf32>,
    %c0_i32_30 = arith.constant 0 : i32
    %63 = arith.cmpi eq, %arg1, %c0_i32_30 : i32
    %64 = arith.extui %63 : i1 to i32
    %c0_i32_31 = arith.constant 0 : i32
    %65 = arith.cmpi ne, %64, %c0_i32_31 : i32
    scf.if %65 {
      %c0_32 = arith.constant 0 : index
      %c0_33 = arith.constant 0 : index
      %66 = vector.load %arg10[%c0_32, %c0_33] : memref<8x1xf32, #tpu.memory_space<vmem>>, vector<8x1xf32>
      %cst_34 = arith.constant 0.000000e+00 : f32
      %67 = vector.broadcast %cst_34 : f32 to vector<8x1xf32>
      %68 = arith.cmpf ogt, %66, %67 : vector<8x1xf32>
      %c0_35 = arith.constant 0 : index
      %c0_36 = arith.constant 0 : index
      %69 = vector.load %arg8[%c0_35, %c0_36] : memref<8x1xf32, #tpu.memory_space<vmem>>, vector<8x1xf32>
      %c0_37 = arith.constant 0 : index
      %c0_38 = arith.constant 0 : index
      %70 = vector.load %arg9[%c0_37, %c0_38] : memref<8x1xf32, #tpu.memory_space<vmem>>, vector<8x1xf32>
      %71 = math.log %70 : vector<8x1xf32>
      %72 = arith.mulf %66, %71 : vector<8x1xf32>
      %73 = arith.subf %69, %72 : vector<8x1xf32>
      %cst_39 = arith.constant 1.000000e+00 : f32
      %74 = vector.broadcast %cst_39 : f32 to vector<8x1xf32>
      %75 = arith.select %68, %66, %74 : vector<8x1xi1>, vector<8x1xf32>
      %76 = tpu.reciprocal %75 {approx = true} : vector<8x1xf32> -> vector<8x1xf32>
      %77 = arith.mulf %73, %76 : vector<8x1xf32>
      %cst_40 = arith.constant 0.000000e+00 : f32
      %78 = vector.broadcast %cst_40 : f32 to vector<8x1xf32>
      %79 = arith.select %68, %77, %78 : vector<8x1xi1>, vector<8x1xf32>
      %cst_41 = arith.constant -7.000000e-02 : f32
      %80 = vector.broadcast %cst_41 : f32 to vector<8x1xf32>
      %81 = arith.mulf %79, %80 : vector<8x1xf32>
      %c0_42 = arith.constant 0 : index
      %c0_43 = arith.constant 0 : index
      %82 = vector.load %arg6[%c0_42, %c0_43] : memref<8x1xf32, #tpu.memory_space<vmem>>, vector<8x1xf32>
      tpu.vector_store %arg6[%c0_42, %c0_43], %81 {strides = array<i32>} : memref<8x1xf32, #tpu.memory_space<vmem>>, vector<8x1xf32>,
      %83 = arith.extui %68 : vector<8x1xi1> to vector<8x1xi32>
      %84 = arith.sitofp %83 : vector<8x1xi32> to vector<8x1xf32>
      %c0_44 = arith.constant 0 : index
      %c0_45 = arith.constant 0 : index
      %85 = vector.load %arg7[%c0_44, %c0_45] : memref<8x1xf32, #tpu.memory_space<vmem>>, vector<8x1xf32>
      tpu.vector_store %arg7[%c0_44, %c0_45], %84 {strides = array<i32>} : memref<8x1xf32, #tpu.memory_space<vmem>>, vector<8x1xf32>,
    } else {
    }
    return
  }
  func.func @transform_0(%arg0: i32, %arg1: i32) -> (i32, i32) {
    %c0_i32 = arith.constant 0 : i32
    %c0_i32_0 = arith.constant 0 : i32
    return %arg0, %c0_i32 : i32, i32
  }
  func.func @transform_1(%arg0: i32, %arg1: i32) -> (i32, i32) {
    %c0_i32 = arith.constant 0 : i32
    %c0_i32_0 = arith.constant 0 : i32
    return %c0_i32, %arg1 : i32, i32
  }
  func.func @transform_2(%arg0: i32, %arg1: i32) -> (i32, i32) {
    %c0_i32 = arith.constant 0 : i32
    %c0_i32_0 = arith.constant 0 : i32
    return %arg0, %c0_i32 : i32, i32
  }
  func.func @transform_3(%arg0: i32, %arg1: i32) -> (i32, i32) {
    %c0_i32 = arith.constant 0 : i32
    %c0_i32_0 = arith.constant 0 : i32
    return %arg1, %c0_i32 : i32, i32
  }
  func.func @transform_4(%arg0: i32, %arg1: i32) -> (i32, i32) {
    %c0_i32 = arith.constant 0 : i32
    %c0_i32_0 = arith.constant 0 : i32
    return %arg0, %c0_i32 : i32, i32
  }
  func.func @transform_5(%arg0: i32, %arg1: i32) -> (i32, i32) {
    %c0_i32 = arith.constant 0 : i32
    %c0_i32_0 = arith.constant 0 : i32
    return %arg0, %c0_i32 : i32, i32
  }
}

</mosaic_0001>

<bundles_post_ra>
// kernel: tpu_custom_call.1
= control target key start
LH: loop header
LB: loop body
LE: loop exit
PB: predicated region body
PF: predicated region fallthrough
CT: control target
= control target key end

     0   :  { %11 = vsyncpa [#allocation6], 0  ;;  %s267_s18 = smov [#allocation5]   ;;  %s348_s0 = inlined_call_operand.vmem [shape: s32[8,1], index: 0, kind: input, shape index: {}]   ;;  %s349_s1 = inlined_call_operand.hbm [shape: s32[1,8], index: 1, kind: input, shape index: {}]   ;;  %s350_s2 = inlined_call_operand.vmem [shape: f32[8,32], index: 2, kind: input, shape index: {}]   ;;  %s351_s3 = inlined_call_operand.vmem [shape: f32[8,32], index: 3, kind: input, shape index: {}]   ;;  %s352_s4 = inlined_call_operand.vmem [shape: f32[8,1], index: 4, kind: output, shape index: {0}]   ;;  %s353_s5 = inlined_call_operand.vmem [shape: f32[8,1], index: 5, kind: output, shape index: {1}]  }
   0x1   :  { %s20_s19 = sshll.u32 %s267_s18, 4  ;;  %s243_s22 = scalar_lea.hbm %s349_s1, 16  ;;  %s21_s19 = int_to_ptr.vmem [resolvable:$true] %s20_s19 }
   0x2   :  { %p244_p0 = scmp.ne.s32.totalorder %s349_s1, %s243_s22  ;;  %p247_p1 = scmp.lt.u32.totalorder %s243_s22, %s349_s1 }
   0x4   :  { %p249_p2 = pnand %p247_p1, %p244_p0 }
   0x6   :  { %252 = shalt.err (!%p249_p2)
}
   0x7   :  { %s253_s27 = scalar_lea.vmem %s21_s19, 16  ;;  %s257_s28 = scalar_lea.vmem %s21_s19, 32 }
   0x8   :  { %p254_p3 = scmp.ne.s32.totalorder %s21_s19, %s253_s27  ;;  %p258_p4 = scmp.lt.s32.totalorder %s21_s19, %s21_s19 }
   0x9   :  { %p259_p5 = scmp.lt.s32.totalorder %s257_s28, %s253_s27 }
   0xb   :  { %p260_p6 = por %p259_p5, %p258_p4 }
   0xd   :  { %p261_p7 = pnand %p260_p6, %p254_p3 }
   0xf   :  { %264 = shalt.err (!%p261_p7)
}
  0x10   :  { %23 = dma.hbm_to_vmem [thread:$0]  %s349_s1, 16, %s21_s19, [#allocation6]  }
  0x11   :  { %265 = dma.done.wait [#allocation6], 16  }
  0x12   :  { %266 = vsyncadd [#allocation6], 4294967280  ;;  %vm41_vm0 = vcmask 261120   ;;  %v48_v0 = vld [vmem:[%s351_s3] sm:$0xff]  ;;  %v268_v6 = vmov 0.0   ;;  %vm269_vm1 = vmmov 0   ;;  %v134_v17 = vlaneseq }
  0x13   :  { %v39_v1 = vld [vmem:[%s350_s2] sm:$0xff]  ;;  %v49_v2 = vmul.f32 %v48_v0, %v48_v0  ;;  %222 = vmatprep.subr.mxu0 %v268_v6  ;;  %224 = vmatprep.mubr.msk.f32.mxu0 %vm269_vm1, %v268_v6  ;;  %v270_v8 = vmov 0   ;;  %v216_v20 = vld [vmem:[#allocation5] ss:$0 sm:$0xff]  ;;  %vm164_vm5 = vcmask 64512   ;;  %vm35_vm6 = vcmask 7168  }
  0x14   :  { %v40_v3 = vmul.f32 %v39_v1, %v39_v1  ;;  %v145_v7 = vld [vmem:[%s348_s0] sm:$0xff]  ;;  %231 = vset.pattern.permute.xlu1 %v270_v8  ;;  %232 = vset.pattern.permute.xlu0 %v270_v8  ;;  %v135_v18 = vshrl.u32 %v134_v17, 7  ;;  %v140_v19 = vand.u32 127, %v134_v17  ;;  %38 = vst.msk [vmem:[#allocation4] sm:$0xff] %vm35_vm6, %v268_v6  ;;  %36 = vst.msk [vmem:[#allocation2] sm:$0xff] %vm35_vm6, %v268_v6 }
  0x15   :  { %v50_v4 = vsel %vm41_vm0, %v49_v2, 0.0  ;;  %148 = vperm.xlu1 %231, %v145_v7   ;;  %37 = vst.msk [vmem:[#allocation3] sm:$0xff] %vm35_vm6, %v268_v6 }
  0x16   :  { %51 = vadd.xlane.f32.xlu0 %v50_v4  ;;  %v42_v5 = vsel %vm41_vm0, %v40_v3, 0.0  ;;  %vm144_vm2 = vcmp.ne.s32.totalorder %v135_v18, %v140_v19 }
  0x17   :  { %v218_v31 = vsel %vm144_vm2, 1.0, %v268_v6 }
  0x1a   :  { %43 = vadd.xlane.f32.xlu0 %v42_v5 }
  0x1b   :  { %v178_v32 = vld [vmem:[#allocation4] sm:$0xff]  ;;  %v171_v40 = vld [vmem:[#allocation2] sm:$0xff] }
  0x1c   :  { %v162_v43 = vld [vmem:[#allocation3] sm:$0xff] }
  0x94   :  { %v149_v21 = vpop.permute.xlu1 %148 }
  0x95   :  { %vm154_vm3 = vcmp.eq.s32.totalorder %v149_v21, %v216_v20 }
  0x96   :  { %vm155_vm4 = vmand %vm154_vm3, %vm144_vm2 }
  0x97   :  { %v217_v22 = vsel %vm155_vm4, 1.0, %v268_v6 }
  0x98   :  { %v179_v23 = vsel %vm164_vm5, %v217_v22, 0.0 }
  0x99   :  { %180 = vadd.xlane.f32.xlu0 %v179_v23 }
  0xa3   :  { %v52_v9 = vpop.xlane.xlu0 %51 }
  0xa4   :  { %v53_v10 = vmax.f32 %v52_v9, 1e-24 }
  0xa6   :  { %233 = vrsqrt.f32 %v53_v10 }
  0xa7   :  { %v44_v11 = vpop.xlane.xlu0 %43 }
  0xa8   :  { %v45_v12 = vmax.f32 %v44_v11, 1e-24 }
  0xaa   :  { %235 = vrsqrt.f32 %v45_v12 }
  0xb0   :  { %v234_v13 = vpop.eup %233 }
  0xb1   :  { %v55_v14 = vmul.f32 %v234_v13, %v48_v0 }
  0xb3   :  { %223 = vmatpush3.xpose.msk.msra.mxu0 %vm41_vm0, %v55_v14 }
  0xb4   :  { %v236_v15 = vpop.eup %235 }
  0xb5   :  { %v47_v16 = vmul.f32 %v236_v15, %v39_v1 }
  0xb7   :  { %225 = vmatmul.mubr.msk.f32.vlgmr.msra.gmra.mrb[0].mxu0 %vm41_vm0, %v47_v16 }
 0x126   :  { %v181_v34 = vpop.xlane.xlu0 %180 }
 0x127   :  { %v182_v36 = vadd.f32 %v181_v34, %v178_v32 }
 0x129   :  { %183 = vst.msk [vmem:[#allocation4] sm:$0xff] %vm35_vm6, %v182_v36 }
 0x130   :  { %v187_v38 = vld [vmem:[#allocation4] sm:$0xff] }
 0x131   :  { %vm188_vm7 = vcmp.gt.f32.partialorder %v187_v38, 0.0 }
 0x132   :  { %v219_v39 = vsel %vm188_vm7, 1.0, %v268_v6  ;;  %v195_v47 = vsel %vm188_vm7, %v187_v38, 1.0 }
 0x133   :  { %203 = vst.msk [vmem:[%s353_s5] sm:$0xff] %vm35_vm6, %v219_v39 }
 0x18a   :  { %v128_v24 = vpop.f32.mrb[0].mxu0 }
 0x18b   :  { %v215_v25 = vadd.f32 -1.0, %v128_v24  ;;  %v226_v26 = vpop.f32.mrb[1].mxu0 }
 0x18d   :  { %v133_v27 = vmul.f32 14.285714, %v215_v25 }
 0x18f   :  { %v160_v28 = vmul.f32 1.442695, %v133_v27  ;;  %v172_v29 = vmul.f32 %v217_v22, %v133_v27 }
 0x191   :  { %237 = vpow2.f32 %v160_v28  ;;  %v173_v30 = vsel %vm164_vm5, %v172_v29, 0.0 }
 0x192   :  { %174 = vadd.xlane.f32.xlu0 %v173_v30 }
 0x19b   :  { %v238_v33 = vpop.eup %237 }
 0x19c   :  { %v163_v35 = vmul.f32 %v238_v33, %v218_v31 }
 0x19e   :  { %v165_v37 = vsel %vm164_vm5, %v163_v35, 0.0 }
 0x19f   :  { %166 = vadd.xlane.f32.xlu1 %v165_v37 }
 0x21f   :  { %v175_v41 = vpop.xlane.xlu0 %174 }
 0x220   :  { %v176_v42 = vadd.f32 %v175_v41, %v171_v40 }
 0x222   :  { %177 = vst.msk [vmem:[#allocation2] sm:$0xff] %vm35_vm6, %v176_v42 }
 0x229   :  { %v189_v52 = vld [vmem:[#allocation2] sm:$0xff] }
 0x22c   :  { %v167_v44 = vpop.xlane.xlu1 %166 }
 0x22d   :  { %v168_v45 = vadd.f32 %v167_v44, %v162_v43 }
 0x22f   :  { %170 = vst.msk [vmem:[#allocation3] sm:$0xff] %vm35_vm6, %v168_v45 }
 0x236   :  { %v190_v46 = vld [vmem:[#allocation3] sm:$0xff] }
 0x237   :  { %239 = vlog2.f32 %v190_v46 }
 0x238   :  { %241 = vrcp.f32 %v195_v47 }
 0x241   :  { %v240_v48 = vpop.eup %239 }
 0x242   :  { %v192_v49 = vmul.f32 0.6931472, %v240_v48  ;;  %v242_v51 = vpop.eup %241 }
 0x244   :  { %v193_v50 = vmul.f32 %v192_v49, %v187_v38 }
 0x246   :  { %v194_v53 = vsub.f32 %v189_v52, %v193_v50 }
 0x248   :  { %v197_v54 = vmul.f32 %v242_v51, %v194_v53 }
 0x24a   :  { %v198_v55 = vsel %vm188_vm7, %v197_v54, 0.0 }
 0x24b   :  { %v199_v56 = vmul.f32 -0.07, %v198_v55 }
 0x24d   :  { %200 = vst.msk [vmem:[%s352_s4] sm:$0xff] %vm35_vm6, %v199_v56 }
 0x24e   :  { %212 = vsyncpa [#allocation6], 1 }

</bundles_post_ra>
